<compile_context>
chip_gen: v6e
topology: v6e:2x2x1
jax: 0.10.0
libtpu: 0.0.40
codegen_flags: <defaults>
</compile_context>

<pallas_src>
import functools
import math

import jax
import jax.numpy as jnp
from jax.experimental import pallas as pl
from jax.experimental.pallas import tpu as pltpu


def _dice_partial_kernel(pre_ref, gt_ref, inter_ref, card_ref, *,
                         bm, kh, m_total, needs_mask):
    """Grid = (N, n_split, Kh).

    pre_ref, gt_ref     : (C, bm) VMEM input tiles (one reduction chunk).
    inter_ref, card_ref : (C, 1) f32 accumulators, resident across the K axis.
    Static params:
      bm         : columns per reduction tile.
      kh         : K steps per split half.
      m_total    : true (unpadded) folded spatial size M.
      needs_mask : whether any tile can contain out-of-range columns.
    """
    h = pl.program_id(1)
    k = pl.program_id(2)

    @pl.when(k == 0)
    def _init():
        inter_ref[...] = jnp.zeros_like(inter_ref)
        card_ref[...] = jnp.zeros_like(card_ref)

    # Cast in-kernel so narrow HBM dtypes stay narrow on the wire.
    p = pre_ref[...].astype(jnp.float32)
    g = gt_ref[...].astype(jnp.float32)

    def _accumulate(p, g):
        inter_ref[...] += jnp.sum(p * g, axis=-1, keepdims=True)
        card_ref[...] += (jnp.sum(p, axis=-1, keepdims=True)
                          + jnp.sum(g, axis=-1, keepdims=True))

    if not needs_mask:
        _accumulate(p, g)
    else:
        # Global reduction-tile index this grid step is responsible for.
        t = h * kh + k
        tile_end = (t + 1) * bm

        @pl.when(tile_end <= m_total)
        def _full_tile():
            _accumulate(p, g)

        @pl.when(tile_end > m_total)
        def _edge_tile():
            # Mask columns past M.  Covers both the ragged last real tile and
            # any fully out-of-range "phantom" tile created by the 2-way K
            # split (whose DMA block index is clamped to the last real block).
            col = t * bm + jax.lax.broadcasted_iota(jnp.int32, (1, bm), 1)
            valid = col < m_total
            _accumulate(jnp.where(valid, p, 0.0), jnp.where(valid, g, 0.0))


def dice_loss(pre, gt, *, target_tile_bytes=4 << 20):
    """Dice loss matching the PyTorch module's forward.

    pre, gt: (N, C, *spatial) arrays of identical shape (gt assumed one-hot).
    Any float/int input dtype; accumulation is float32 in-kernel.
    Returns a float32 scalar loss.
    """
    assert pre.shape == gt.shape, "pre and gt (one-hot) must share shape"
    N, C = pre.shape[:2]
    M = math.prod(pre.shape[2:])

    pre_item = jnp.dtype(pre.dtype).itemsize
    gt_item = jnp.dtype(gt.dtype).itemsize
    itemsize = max(pre_item, gt_item)

    # Reduction tile width (columns of the folded spatial axis).
    if C * M * itemsize <= target_tile_bytes:
        bm = M                       # whole axis in one tile (== full dim, legal)
        num_k_real = 1
    else:
        bm = max(128, (target_tile_bytes // (C * itemsize)) // 128 * 128)
        # TODO(synk): for very large class counts (C*128*itemsize > target)
        #             the C axis itself should be tiled with a fourth grid axis.
        num_k_real = (M + bm - 1) // bm

    # 2-way split of the K range -> both v7x TensorCores stay busy even when
    # the batch axis alone can't be split evenly (N == 1 or odd N).
    n_split = 2 if num_k_real >= 2 else 1
    kh = (num_k_real + n_split - 1) // n_split
    needs_mask = (M % bm != 0) or (n_split * kh != num_k_real)

    # Free reshapes only (no pad, no copy).
    pre3 = pre.reshape(N, C, M)
    gt3 = gt.reshape(N, C, M)

    last_block = num_k_real - 1

    def in_map(n, h, k):
        # Clamp so phantom tiles (from the split round-up) DMA a valid block;
        # their contribution is zeroed by the in-kernel mask.
        return (n, 0, jnp.minimum(h * kh + k, last_block))

    def out_map(n, h, k):
        return (n, h, 0, 0)

    kernel = functools.partial(_dice_partial_kernel, bm=bm, kh=kh,
                               m_total=M, needs_mask=needs_mask)

    # VMEM budget derived from the actual tile size (2 pipeline buffers per
    # input) + margin; keeps us inside every generation's scoped limit.
    in_bytes_per_step = C * bm * (pre_item + gt_item)
    vmem_limit = int(min(max(2 * in_bytes_per_step + (4 << 20), 24 << 20),
                         56 << 20))

    cost = pl.CostEstimate(
        flops=4 * N * C * M,
        transcendentals=0,
        bytes_accessed=N * C * M * (pre_item + gt_item) + 2 * N * n_split * C * 4,
    )

    inter_part, card_part = pl.pallas_call(
        kernel,
        out_shape=(
            jax.ShapeDtypeStruct((N, n_split, C, 1), jnp.float32),
            jax.ShapeDtypeStruct((N, n_split, C, 1), jnp.float32),
        ),
        grid=(N, n_split, kh),
        in_specs=[
            pl.BlockSpec((None, C, bm), in_map),
            pl.BlockSpec((None, C, bm), in_map),
        ],
        out_specs=(
            pl.BlockSpec((None, None, C, 1), out_map),
            pl.BlockSpec((None, None, C, 1), out_map),
        ),
        compiler_params=pltpu.CompilerParams(
            dimension_semantics=("parallel", "parallel", "arbitrary"),
            vmem_limit_bytes=vmem_limit,
        ),
        cost_estimate=cost,
    )(pre3, gt3)

    # Tiny finalize in plain JAX: cross-batch/half sums, dice, class mean.
    intersection = jnp.sum(inter_part, axis=(0, 1, 3))   # (C,)
    cardinality = jnp.sum(card_part, axis=(0, 1, 3))     # (C,)
    eps = 1e-6
    dice = jnp.mean(2.0 * intersection / (cardinality + eps))
    return (1.0 - dice).astype(jnp.float32)


def dice_loss_ref(pre, gt):
    """Pure-JAX reference with the same semantics (for sanity check)."""
    pre = pre.astype(jnp.float32)
    gt = gt.astype(jnp.float32)
    eps = 1e-6
    dims = (0,) + tuple(range(2, pre.ndim))
    intersection = jnp.sum(pre * gt, axis=dims)
    cardinality = jnp.sum(pre + gt, axis=dims)
    dice = jnp.mean(2.0 * intersection / (cardinality + eps))
    return 1.0 - dice


if __name__ == "__main__":
    key = jax.random.PRNGKey(0)
    k_pre, k_lbl, k_pre2, k_lbl2 = jax.random.split(key, 4)

    # Test 1: aligned shapes, f32, single-tile fast path.
    N, C, H, W = 2, 4, 16, 16
    logits = jax.random.normal(k_pre, (N, C, H, W), dtype=jnp.float32)
    pre = jax.nn.softmax(logits, axis=1)
    labels = jax.random.randint(k_lbl, (N, H, W), 0, C)
    gt = jnp.transpose(jax.nn.one_hot(labels, C, dtype=jnp.float32), (0, 3, 1, 2))
    loss = jax.block_until_ready(dice_loss(pre, gt))
    ref = jax.block_until_ready(dice_loss_ref(pre, gt))
    assert abs(float(loss) - float(ref)) < 1e-5, (float(loss), float(ref))

    # Test 2: ragged spatial size + tiny tile target exercises the masked edge
    # tile and the clamped phantom tile of the 2-way K split; bf16 predictions
    # exercise the narrow-dtype in-kernel cast.
    N2, C2, H2, W2 = 1, 3, 27, 11
    logits2 = jax.random.normal(k_pre2, (N2, C2, H2, W2), dtype=jnp.float32)
    pre2 = jax.nn.softmax(logits2, axis=1).astype(jnp.bfloat16)
    labels2 = jax.random.randint(k_lbl2, (N2, H2, W2), 0, C2)
    gt2 = jnp.transpose(jax.nn.one_hot(labels2, C2, dtype=jnp.float32), (0, 3, 1, 2))
    loss2 = jax.block_until_ready(dice_loss(pre2, gt2, target_tile_bytes=2048))
    ref2 = jax.block_until_ready(dice_loss_ref(pre2, gt2))
    assert abs(float(loss2) - float(ref2)) < 1e-4, (float(loss2), float(ref2))

    print("KERNEL_OK")
</pallas_src>

<mosaic_0001>
module attributes {stable_mosaic.version = 11 : i64} {
  func.func @_dice_partial_kernel(%arg0: i32, %arg1: i32, %arg2: i32, %arg3: memref<1x4x256xf32, #tpu.memory_space<vmem>>, %arg4: memref<1x4x256xf32, #tpu.memory_space<vmem>>, %arg5: memref<1x1x4x1xf32, #tpu.memory_space<vmem>>, %arg6: memref<1x1x4x1xf32, #tpu.memory_space<vmem>>) attributes {dimension_semantics = [#tpu.dimension_semantics<parallel>, #tpu.dimension_semantics<parallel>, #tpu.dimension_semantics<arbitrary>], iteration_bounds = array<i64: 2, 1, 1>, scalar_prefetch = 0 : i64, scratch_operands = 0 : i64, tpu.core_type = #tpu.core_type<tc>, window_params = [{transform_indices = @transform_0, window_bounds = array<i64: 1, 4, 256>}, {transform_indices = @transform_1, window_bounds = array<i64: 1, 4, 256>}, {transform_indices = @transform_2, window_bounds = array<i64: 1, 1, 4, 1>}, {transform_indices = @transform_3, window_bounds = array<i64: 1, 1, 4, 1>}]} {
    %c0_i32 = arith.constant 0 : i32
    %0 = arith.cmpi eq, %arg2, %c0_i32 : i32
    %1 = arith.extui %0 : i1 to i32
    %c0_i32_0 = arith.constant 0 : i32
    %2 = arith.cmpi ne, %1, %c0_i32_0 : i32
    scf.if %2 {
      %cst_24 = arith.constant 0.000000e+00 : f32
      %27 = vector.broadcast %cst_24 : f32 to vector<4x1xf32>
      %c0_25 = arith.constant 0 : index
      %c0_26 = arith.constant 0 : index
      %c0_27 = arith.constant 0 : index
      %c0_28 = arith.constant 0 : index
      %28 = vector.load %arg5[%c0_25, %c0_26, %c0_27, %c0_28] : memref<1x1x4x1xf32, #tpu.memory_space<vmem>>, vector<1x1x4x1xf32>
      %29 = vector.shape_cast %28 : vector<1x1x4x1xf32> to vector<4x1xf32>
      %30 = vector.shape_cast %27 : vector<4x1xf32> to vector<1x1x4x1xf32>
      tpu.vector_store %arg5[%c0_25, %c0_26, %c0_27, %c0_28], %30 {strides = array<i32>} : memref<1x1x4x1xf32, #tpu.memory_space<vmem>>, vector<1x1x4x1xf32>,
      %cst_29 = arith.constant 0.000000e+00 : f32
      %31 = vector.broadcast %cst_29 : f32 to vector<4x1xf32>
      %c0_30 = arith.constant 0 : index
      %c0_31 = arith.constant 0 : index
      %c0_32 = arith.constant 0 : index
      %c0_33 = arith.constant 0 : index
      %32 = vector.load %arg6[%c0_30, %c0_31, %c0_32, %c0_33] : memref<1x1x4x1xf32, #tpu.memory_space<vmem>>, vector<1x1x4x1xf32>
      %33 = vector.shape_cast %32 : vector<1x1x4x1xf32> to vector<4x1xf32>
      %34 = vector.shape_cast %31 : vector<4x1xf32> to vector<1x1x4x1xf32>
      tpu.vector_store %arg6[%c0_30, %c0_31, %c0_32, %c0_33], %34 {strides = array<i32>} : memref<1x1x4x1xf32, #tpu.memory_space<vmem>>, vector<1x1x4x1xf32>,
    } else {
    }
    %c0 = arith.constant 0 : index
    %c0_1 = arith.constant 0 : index
    %c0_2 = arith.constant 0 : index
    %3 = vector.load %arg3[%c0, %c0_1, %c0_2] : memref<1x4x256xf32, #tpu.memory_space<vmem>>, vector<1x4x256xf32>
    %4 = vector.shape_cast %3 : vector<1x4x256xf32> to vector<4x256xf32>
    %c0_3 = arith.constant 0 : index
    %c0_4 = arith.constant 0 : index
    %c0_5 = arith.constant 0 : index
    %5 = vector.load %arg4[%c0_3, %c0_4, %c0_5] : memref<1x4x256xf32, #tpu.memory_space<vmem>>, vector<1x4x256xf32>
    %6 = vector.shape_cast %5 : vector<1x4x256xf32> to vector<4x256xf32>
    %c0_6 = arith.constant 0 : index
    %c0_7 = arith.constant 0 : index
    %c0_8 = arith.constant 0 : index
    %c0_9 = arith.constant 0 : index
    %7 = vector.load %arg5[%c0_6, %c0_7, %c0_8, %c0_9] : memref<1x1x4x1xf32, #tpu.memory_space<vmem>>, vector<1x1x4x1xf32>
    %8 = vector.shape_cast %7 : vector<1x1x4x1xf32> to vector<4x1xf32>
    %9 = arith.mulf %4, %6 : vector<4x256xf32>
    %cst = arith.constant dense<0.000000e+00> : vector<4xf32>
    %10 = vector.multi_reduction <add>, %9, %cst [1] : vector<4x256xf32> to vector<4xf32>
    %11 = vector.shape_cast %10 : vector<4xf32> to vector<4x1xf32>
    %12 = arith.addf %8, %11 : vector<4x1xf32>
    %c0_10 = arith.constant 0 : index
    %c0_11 = arith.constant 0 : index
    %c0_12 = arith.constant 0 : index
    %c0_13 = arith.constant 0 : index
    %13 = vector.load %arg5[%c0_10, %c0_11, %c0_12, %c0_13] : memref<1x1x4x1xf32, #tpu.memory_space<vmem>>, vector<1x1x4x1xf32>
    %14 = vector.shape_cast %13 : vector<1x1x4x1xf32> to vector<4x1xf32>
    %15 = vector.shape_cast %12 : vector<4x1xf32> to vector<1x1x4x1xf32>
    tpu.vector_store %arg5[%c0_10, %c0_11, %c0_12, %c0_13], %15 {strides = array<i32>} : memref<1x1x4x1xf32, #tpu.memory_space<vmem>>, vector<1x1x4x1xf32>,
    %c0_14 = arith.constant 0 : index
    %c0_15 = arith.constant 0 : index
    %c0_16 = arith.constant 0 : index
    %c0_17 = arith.constant 0 : index
    %16 = vector.load %arg6[%c0_14, %c0_15, %c0_16, %c0_17] : memref<1x1x4x1xf32, #tpu.memory_space<vmem>>, vector<1x1x4x1xf32>
    %17 = vector.shape_cast %16 : vector<1x1x4x1xf32> to vector<4x1xf32>
    %cst_18 = arith.constant dense<0.000000e+00> : vector<4xf32>
    %18 = vector.multi_reduction <add>, %4, %cst_18 [1] : vector<4x256xf32> to vector<4xf32>
    %19 = vector.shape_cast %18 : vector<4xf32> to vector<4x1xf32>
    %cst_19 = arith.constant dense<0.000000e+00> : vector<4xf32>
    %20 = vector.multi_reduction <add>, %6, %cst_19 [1] : vector<4x256xf32> to vector<4xf32>
    %21 = vector.shape_cast %20 : vector<4xf32> to vector<4x1xf32>
    %22 = arith.addf %19, %21 : vector<4x1xf32>
    %23 = arith.addf %17, %22 : vector<4x1xf32>
    %c0_20 = arith.constant 0 : index
    %c0_21 = arith.constant 0 : index
    %c0_22 = arith.constant 0 : index
    %c0_23 = arith.constant 0 : index
    %24 = vector.load %arg6[%c0_20, %c0_21, %c0_22, %c0_23] : memref<1x1x4x1xf32, #tpu.memory_space<vmem>>, vector<1x1x4x1xf32>
    %25 = vector.shape_cast %24 : vector<1x1x4x1xf32> to vector<4x1xf32>
    %26 = vector.shape_cast %23 : vector<4x1xf32> to vector<1x1x4x1xf32>
    tpu.vector_store %arg6[%c0_20, %c0_21, %c0_22, %c0_23], %26 {strides = array<i32>} : memref<1x1x4x1xf32, #tpu.memory_space<vmem>>, vector<1x1x4x1xf32>,
    return
  }
  func.func @transform_0(%arg0: i32, %arg1: i32, %arg2: i32) -> (i32, i32, i32) {
    %c1_i32 = arith.constant 1 : i32
    %0 = arith.muli %arg1, %c1_i32 : i32
    %1 = arith.addi %0, %arg2 : i32
    %c0_i32 = arith.constant 0 : i32
    %2 = arith.minsi %1, %c0_i32 : i32
    %c0_i32_0 = arith.constant 0 : i32
    %c0_i32_1 = arith.constant 0 : i32
    return %arg0, %c0_i32_0, %2 : i32, i32, i32
  }
  func.func @transform_1(%arg0: i32, %arg1: i32, %arg2: i32) -> (i32, i32, i32) {
    %c1_i32 = arith.constant 1 : i32
    %0 = arith.muli %arg1, %c1_i32 : i32
    %1 = arith.addi %0, %arg2 : i32
    %c0_i32 = arith.constant 0 : i32
    %2 = arith.minsi %1, %c0_i32 : i32
    %c0_i32_0 = arith.constant 0 : i32
    %c0_i32_1 = arith.constant 0 : i32
    return %arg0, %c0_i32_0, %2 : i32, i32, i32
  }
  func.func @transform_2(%arg0: i32, %arg1: i32, %arg2: i32) -> (i32, i32, i32, i32) {
    %c0_i32 = arith.constant 0 : i32
    %c0_i32_0 = arith.constant 0 : i32
    %c0_i32_1 = arith.constant 0 : i32
    return %arg0, %arg1, %c0_i32, %c0_i32_0 : i32, i32, i32, i32
  }
  func.func @transform_3(%arg0: i32, %arg1: i32, %arg2: i32) -> (i32, i32, i32, i32) {
    %c0_i32 = arith.constant 0 : i32
    %c0_i32_0 = arith.constant 0 : i32
    %c0_i32_1 = arith.constant 0 : i32
    return %arg0, %arg1, %c0_i32, %c0_i32_0 : i32, i32, i32, i32
  }
}

</mosaic_0001>

<bundles_post_ra>
// kernel: tpu_custom_call.1
= control target key start
LH: loop header
LB: loop body
LE: loop exit
PB: predicated region body
PF: predicated region fallthrough
CT: control target
= control target key end

     0   :  { %9 = vsyncpa [#allocation3], 0  ;;  %s850_s0 = inlined_call_operand.hbm [shape: f32[2,4,256], index: 0, kind: input, shape index: {}]   ;;  %s851_s1 = inlined_call_operand.hbm [shape: f32[2,4,256], index: 1, kind: input, shape index: {}]   ;;  %s852_s2 = inlined_call_operand.vmem [shape: f32[2,1,4,1], index: 2, kind: output, shape index: {0}]   ;;  %s853_s3 = inlined_call_operand.vmem [shape: f32[2,1,4,1], index: 3, kind: output, shape index: {1}]  }
   0x1   :  { %11 = vsyncpa [#allocation3 + $0x1], 0 }
   0x2   :  { %12 = vsyncpa [#allocation5], 0 }
   0x3   :  { %14 = vsyncpa [#allocation5 + $0x1], 0  ;;  %s721_s12 = smov 0   ;;  %s723_s13 = smov 0  }
   0x4   :  { %s725_s14 = smov 0   ;;  %s727_s15 = smov 0  }
   0x5   :  { %s729_s16 = smov 0   ;;  %s731_s17 = smov 0  }
   0x6 LB: > { %s504_s18 = sadd.s32 4294967295, %s696_s17   ;;  %s39_s19 = sadd.s32 1, %s692_s16  ;;  %s696_s17 = sphi %s731_s17, %s20_s17   ;;  %s692_s16 = sphi %s729_s16, %s862_s16   ;;  %s688_s15 = sphi %s727_s15, %s861_s15   ;;  %s684_s14 = sphi %s725_s14, %s860_s14   ;;  %s680_s13 = sphi %s723_s13, %s859_s13   ;;  %s676_s12 = sphi %s721_s12, %s858_s12  }
   0x7   : > { %p41_p0 = scmp.ge.s32.totalorder %s39_s19, 2  ;;  %s54_s20 = sadd.s32 1, %s684_s14 }
   0x8   : > { %p61_p1 = scmp.ne.s32.totalorder %s684_s14, %s680_s13  ;;  %p62_p2 = scmp.eq.s32.totalorder %s696_s17, 0 }
   0x9   : > { %s864_s19 = smov (%p41_p0, %s39_s19), 0  ;;  %p67_p4 = scmp.ne.s32.totalorder %s680_s13, %s676_s12 }
   0xa   : > { %p757_p3 = por %p62_p2, %p61_p1  ;;  %s49_s22 = ssub.s32 %s692_s16, %s864_s19 }
   0xb   : > { %p68_p5 = scmp.eq.s32.totalorder %s504_s18, 0  ;;  %p52_p6 = scmp.eq.s32.totalorder %s49_s22, 0 }
   0xc   : > { %p534_p8 = scmp.lt.s32.totalorder %s696_s17, 2  ;;  %s773_s25 = sand.u32 1, %s684_s14  }
   0xd   : > { %p764_p7 = por %p68_p5, %p67_p4  ;;  %s521_s26 = sshll.u32 %s692_s16, 7 }
   0xe   : > { %s770_s24 = scalar_select %p52_p6, %s684_s14, %s54_s20  }
   0xf   : > { %s508_s27 = sshll.u32 %s773_s25, 3  ;;  %s196_s30 = scalar_lea.hbm %s850_s0, %s521_s26 }
  0x10   : > { %s185_s4 = scalar_lea.vmem [#allocation2], %s508_s27  ;;  %p782_p9 = pnand %p534_p8, %p757_p3 }
  0x11   : > { %s198_s5 = sshll.u32 %s185_s4, 4  ;;  %p514_p10 = scmp.ge.s32.totalorder %s696_s17, 1  ;;  %s199_s5 = int_to_ptr.vmem [resolvable:$true] %s198_s5 }
  0x12   : > { %p227_p11 = scmp.lt.s32.totalorder %s696_s17, 3  ;;  %s182_s7 = scalar_lea.sflag [#allocation3], %s773_s25 }
  0x13   : > { %p588_p12 = pneg %p782_p9  ;;  %s599_s8 = scalar_lea.vmem %s199_s5, 128 }
  0x14   : > { %p600_p13 = scmp.ne.s32.totalorder %s199_s5, %s599_s8  ;;  %s698_s9 = smov [#allocation2]  }
  0x15   : > { %s604_s10 = sshll.u32 %s698_s9, 4  ;;  %s605_s10 = int_to_ptr.vmem [resolvable:$false] %s604_s10 }
  0x16   : > { %p602_p0 = pnand %p600_p13, %p588_p12  ;;  %s606_s11 = scalar_lea.vmem %s605_s10, 256 }
  0x17   : > { %p607_p2 = scmp.lt.s32.totalorder %s199_s5, %s605_s10  ;;  %p608_p3 = scmp.lt.s32.totalorder %s606_s11, %s599_s8 }
  0x18   : > { %p603_p1 = pneg %p602_p0 }
  0x19   : > { %p609_p4 = por %p608_p3, %p607_p2 }
  0x1b   : > { %p610_p5 = pnand %p609_p4, %p603_p1 }
  0x1d   : > { %613 = shalt.err (!%p610_p5)
}
  0x1e   : > { %530 = dma.hbm_to_vmem [thread:$0]  (!%p782_p9), %s196_s30, 128, %s199_s5, %s182_s7  }
  0x1f   : > { %p800_p6 = pnand %p514_p10, %p227_p11  ;;  %s220_s21 = scalar_lea.hbm %s851_s1, %s521_s26 }
  0x20   : > { %s209_s22 = scalar_lea.vmem [#allocation4], %s508_s27  ;;  %s206_s29 = scalar_lea.sflag [#allocation5], %s773_s25 }
  0x21   : > { %s222_s28 = sshll.u32 %s209_s22, 4  ;;  %s699_s30 = smov [#allocation4]   ;;  %s223_s28 = int_to_ptr.vmem [resolvable:$true] %s222_s28 }
  0x22   : > { %s627_s4 = scalar_lea.vmem %s223_s28, 128  ;;  %s632_s5 = sshll.u32 %s699_s30, 4  ;;  %s633_s5 = int_to_ptr.vmem [resolvable:$false] %s632_s5 }
  0x23   : > { %p628_p8 = scmp.ne.s32.totalorder %s223_s28, %s627_s4  ;;  %s634_s7 = scalar_lea.vmem %s633_s5, 256 }
  0x24   : > { %p635_p10 = scmp.lt.s32.totalorder %s223_s28, %s633_s5  ;;  %p636_p11 = scmp.lt.s32.totalorder %s634_s7, %s627_s4 }
  0x25   : > { %p630_p13 = pnand %p628_p8, %p588_p12 }
  0x26   : > { %p637_p1 = por %p636_p11, %p635_p10 }
  0x27   : > { %p631_p0 = pneg %p630_p13 }
  0x29   : > { %p638_p2 = pnand %p637_p1, %p631_p0 }
  0x2b   : > { %641 = shalt.err (!%p638_p2)
}
  0x2c   : > { %533 = dma.hbm_to_vmem [thread:$0]  (!%p782_p9), %s220_s21, 128, %s223_s28, %s206_s29  }
  0x2d   : > { %231 = sbr.rel (%p800_p6) target bundleno = 206 (0xce), region = 28  ;;  %s233_s25 = sand.u32 (!%p800_p6), 1, %s680_s13  }
  0x2e   : > { %s515_s26 = sshll.u32 (!%p800_p6), %s233_s25, 3  ;;  %s234_s27 = scalar_lea.sflag (!%p800_p6), [#allocation3], %s233_s25 }
  0x2f   : > { %s237_s8 = scalar_lea.vmem (!%p800_p6), [#allocation2], %s515_s26 }
  0x32   : > { %667 = dma.done.wait (%p764_p7), %s234_s27, 128  }
  0x33   : > { %669 = vsyncadd (%p764_p7), %s234_s27, 4294967168  ;;  %s243_s9 = scalar_lea.sflag [#allocation5], %s233_s25  ;;  %s246_s10 = scalar_lea.vmem [#allocation4], %s515_s26 }
  0x34   : > { %671 = dma.done.wait (%p764_p7), %s243_s9, 128  }
  0x35   : > { %673 = vsyncadd (%p764_p7), %s243_s9, 4294967168  ;;  %vm319_vm0 = vcmask 1043456   ;;  %v312_v0 = vld [vmem:[%s237_s8] sm:$0xff]  ;;  %v313_v1 = vld [vmem:[%s246_s10] sm:$0xff]  ;;  %p291_p7 = scmp.lt.s32.totalorder %s688_s15, 1  ;;  %vm309_vm1 = vcmask 3072  }
  0x36   : > { %v330_v2 = vcombine.high %v312_v0, %v312_v0  ;;  %v332_v3 = vsel %vm319_vm0, %v312_v0, 0.0  ;;  %v338_v4 = vcombine.high %v313_v1, %v313_v1  ;;  %v315_v5 = vmul.f32 %v313_v1, %v312_v0 }
  0x37   : > { %v340_v7 = vsel %vm319_vm0, %v313_v1, 0.0  ;;  %s866_s15 = smov (!%p291_p7, %s688_s15), 1  ;;  %v700_v15 = vmov 0.0  }
  0x38   : > { %v333_v6 = vsel %vm319_vm0, %v330_v2, 0.0  ;;  %v341_v8 = vsel %vm319_vm0, %v338_v4, 0.0  ;;  %v317_v10 = vcombine.high %v315_v5, %v315_v5  ;;  %v320_v11 = vsel %vm319_vm0, %v315_v5, 0.0  ;;  %s517_s23 = sshll.u32 %s866_s15, 2 }
  0x39   : > { %v334_v9 = vadd.f32 %v333_v6, %v332_v3  ;;  %v342_v12 = vadd.f32 %v341_v8, %v340_v7  ;;  %s304_s12 = scalar_lea.vmem %s853_s3, %s517_s23  ;;  %s297_s21 = scalar_lea.vmem %s852_s2, %s517_s23 }
  0x3a   : > { %v321_v13 = vsel %vm319_vm0, %v317_v10, 0.0  ;;  %311 = vst.msk [vmem:[%s304_s12] sm:$0xf] %vm309_vm1, %v700_v15  ;;  %310 = vst.msk [vmem:[%s297_s21] sm:$0xf] %vm309_vm1, %v700_v15 }
  0x3b   : > { %335 = vadd.xlane.f32.xlu0 %v334_v9  ;;  %v322_v14 = vadd.f32 %v321_v13, %v320_v11 }
  0x3d   : > { %323 = vadd.xlane.f32.xlu1 %v322_v14 }
  0x3f   : > { %343 = vadd.xlane.f32.xlu0 %v342_v12 }
  0x41   : > { %v314_v17 = vld [vmem:[%s297_s21] sm:$0xf] }
  0x42   : > { %v328_v20 = vld [vmem:[%s304_s12] sm:$0xf] }
  0xc4   : > { %v336_v16 = vpop.xlane.xlu0 %335 }
  0xc6   : > { %v324_v18 = vpop.xlane.xlu1 %323 }
  0xc7   : > { %v325_v21 = vadd.f32 %v324_v18, %v314_v17 }
  0xc8   : > { %v344_v19 = vpop.xlane.xlu0 %343 }
  0xc9   : > { %v345_v22 = vadd.f32 %v344_v19, %v336_v16  ;;  %327 = vst.msk [vmem:[%s297_s21] sm:$0xf] %vm309_vm1, %v325_v21 }
  0xcb   : > { %v346_v23 = vadd.f32 %v345_v22, %v328_v20 }
  0xcd   : > { %347 = vst.msk [vmem:[%s304_s12] sm:$0xf] %vm309_vm1, %v346_v23 }
  0xce PF: > { %s20_s17 = sadd.s32 1, %s696_s17   ;;  %s858_s12 = smov %s680_s13 }
  0xcf   : > { %p17_p9 = scmp.ge.s32.totalorder %s20_s17, 4   ;;  %s859_s13 = smov %s684_s14 }
  0xd0   : > { %s860_s14 = smov %s770_s24  ;;  %s861_s15 = smov %s692_s16 }
  0xd1   : > { %s862_s16 = smov %s864_s19  ;;  %19 = sbr.rel (!%p17_p9) target bundleno = 6 (0x6), region = 97 }
  0xd6   :  { %393 = vsyncpa [#allocation3], 1 }
  0xd7   :  { %395 = vsyncpa [#allocation3 + $0x1], 1 }
  0xd8   :  { %396 = vsyncpa [#allocation5], 1 }
  0xd9   :  { %398 = vsyncpa [#allocation5 + $0x1], 1 }

</bundles_post_ra>
